<compile_context>
chip_gen: v6e
topology: v6e:2x2x1
jax: 0.10.0
libtpu: 0.0.40
codegen_flags: <defaults>
</compile_context>

<pallas_src>
import jax
import jax.numpy as jnp
from jax.experimental import pallas as pl
from jax.experimental.pallas import tpu as pltpu


# Lane-dense slab geometry: cols is a large multiple of 128 (full lanes),
# block rows capped so one f32 block is ~2 MiB (input+output double buffers
# stay well under the 16 MiB v5e default scoped-VMEM limit).
_LANE_COLS = 1024
_MAX_BLOCK_ROWS = 512
# Below this element count the pallas_call launch overhead dominates.
_MIN_PALLAS_ELEMENTS = 1 << 16


def _log_compression_kernel(x_ref, o_ref):
    # Elementwise: |x| on the VPU, log1p on the EUP (its own bundle slot).
    x = x_ref[...]
    y = jnp.log1p(jnp.abs(x).astype(jnp.float32))
    o_ref[...] = y.astype(o_ref.dtype)


def _round_up(a: int, b: int) -> int:
    return (a + b - 1) // b * b


def log_compression(x: jax.Array, *, min_pallas_elements: int = _MIN_PALLAS_ELEMENTS) -> jax.Array:
    """Apply log(abs(x) + 1) elementwise; matches torch.log(torch.abs(x) + 1)."""
    orig_shape = x.shape
    orig_dtype = x.dtype
    n = x.size

    if n == 0:
        return x

    # Small-input fast path: the kernel only pays off once HBM-bound.
    if n < min_pallas_elements:
        return jnp.log1p(jnp.abs(x).astype(jnp.float32)).astype(orig_dtype)

    # Flatten to a lane-dense 2-D slab: [rows, 1024].
    flat = x.reshape(-1)
    cols = _LANE_COLS
    rows = pl.cdiv(n, cols)

    if rows <= _MAX_BLOCK_ROWS:
        # Single block equal to the full (padded) array dims — allowed by the
        # "block equals full array dim" exception, no row padding needed.
        block_rows = rows
        padded_rows = rows
    else:
        block_rows = _MAX_BLOCK_ROWS
        padded_rows = _round_up(rows, block_rows)

    padded_n = padded_rows * cols
    if padded_n != n:
        # Zero padding is harmless for log1p(|x|) and is sliced off below.
        flat = jnp.pad(flat, (0, padded_n - n))
    x2d = flat.reshape(padded_rows, cols)

    grid_r = padded_rows // block_rows

    out2d = pl.pallas_call(
        _log_compression_kernel,
        out_shape=jax.ShapeDtypeStruct((padded_rows, cols), orig_dtype),
        grid_spec=pltpu.PrefetchScalarGridSpec(
            num_scalar_prefetch=0,
            grid=(grid_r,),
            in_specs=[pl.BlockSpec((block_rows, cols), lambda i: (i, 0))],
            out_specs=pl.BlockSpec((block_rows, cols), lambda i: (i, 0)),
        ),
        compiler_params=pltpu.CompilerParams(
            dimension_semantics=("parallel",),
        ),
    )(x2d)

    out_flat = out2d.reshape(-1)
    if padded_n != n:
        out_flat = out_flat[:n]
    return out_flat.reshape(orig_shape)


def _reference(x):
    # Same math as torch.log(torch.abs(x) + 1).
    return jnp.log(jnp.abs(x) + 1.0)


if __name__ == "__main__":
    key = jax.random.PRNGKey(0)
    k0, k1, k2 = jax.random.split(key, 3)

    # 1) Small NCHW input consistent with a conv-frontend activation.
    #    Force the Pallas path so the kernel itself is exercised.
    x_small = jax.random.normal(k0, (2, 4, 16, 16), dtype=jnp.float32)
    y_small = log_compression(x_small, min_pallas_elements=0)
    jax.block_until_ready(y_small)
    assert y_small.shape == x_small.shape and y_small.dtype == x_small.dtype
    assert jnp.allclose(y_small, _reference(x_small), atol=1e-6, rtol=1e-6)

    # 2) Awkward (non-lane-aligned) shape exercising the padding path.
    x_mid = jax.random.normal(k1, (2, 8, 63, 129), dtype=jnp.float32)
    y_mid = log_compression(x_mid)
    jax.block_until_ready(y_mid)
    assert y_mid.shape == x_mid.shape and y_mid.dtype == x_mid.dtype
    assert jnp.allclose(y_mid, _reference(x_mid), atol=1e-6, rtol=1e-6)

    # 3) Larger input exercising the multi-block pipelined (grid > 1) path.
    x_big = jax.random.normal(k2, (8, 16, 64, 80), dtype=jnp.float32)
    y_big = log_compression(x_big)
    jax.block_until_ready(y_big)
    assert y_big.shape == x_big.shape and y_big.dtype == x_big.dtype
    assert jnp.allclose(y_big, _reference(x_big), atol=1e-6, rtol=1e-6)

    print("KERNEL_OK")
</pallas_src>

<mosaic_0001>
module attributes {stable_mosaic.version = 11 : i64} {
  func.func @_log_compression_kernel(%arg0: i32, %arg1: memref<2x1024xf32, #tpu.memory_space<vmem>>, %arg2: memref<2x1024xf32, #tpu.memory_space<vmem>>) attributes {dimension_semantics = [#tpu.dimension_semantics<parallel>], iteration_bounds = array<i64: 1>, scalar_prefetch = 0 : i64, scratch_operands = 0 : i64, tpu.core_type = #tpu.core_type<tc>, window_params = [{transform_indices = @transform_0, window_bounds = array<i64: 2, 1024>}, {transform_indices = @transform_1, window_bounds = array<i64: 2, 1024>}]} {
    %c0 = arith.constant 0 : index
    %c0_0 = arith.constant 0 : index
    %0 = vector.load %arg1[%c0, %c0_0] : memref<2x1024xf32, #tpu.memory_space<vmem>>, vector<2x1024xf32>
    %1 = math.absf %0 : vector<2x1024xf32>
    %2 = math.log1p %1 : vector<2x1024xf32>
    %c0_1 = arith.constant 0 : index
    %c0_2 = arith.constant 0 : index
    %3 = vector.load %arg2[%c0_1, %c0_2] : memref<2x1024xf32, #tpu.memory_space<vmem>>, vector<2x1024xf32>
    tpu.vector_store %arg2[%c0_1, %c0_2], %2 {strides = array<i32>} : memref<2x1024xf32, #tpu.memory_space<vmem>>, vector<2x1024xf32>,
    return
  }
  func.func @transform_0(%arg0: i32) -> (i32, i32) {
    %c0_i32 = arith.constant 0 : i32
    %c0_i32_0 = arith.constant 0 : i32
    return %arg0, %c0_i32 : i32, i32
  }
  func.func @transform_1(%arg0: i32) -> (i32, i32) {
    %c0_i32 = arith.constant 0 : i32
    %c0_i32_0 = arith.constant 0 : i32
    return %arg0, %c0_i32 : i32, i32
  }
}

</mosaic_0001>

<bundles_post_ra>
// kernel: tpu_custom_call.1
= control target key start
LH: loop header
LB: loop body
LE: loop exit
PB: predicated region body
PF: predicated region fallthrough
CT: control target
= control target key end

     0   :  { %6 = vsyncpa [#allocation3], 0  ;;  %s128_s0 = inlined_call_operand.hbm [shape: f32[2,1024], index: 0, kind: input, shape index: {}]   ;;  %s129_s1 = inlined_call_operand.hbm [shape: f32[2,1024], index: 1, kind: output, shape index: {}]  }
   0x1   :  { %7 = vsyncpa [#allocation4], 0  ;;  %s110_s6 = smov [#allocation2]  }
   0x2   :  { %s14_s7 = sshll.u32 %s110_s6, 4  ;;  %s15_s7 = int_to_ptr.vmem [resolvable:$true] %s14_s7 }
   0x3   :  { %s74_s8 = scalar_lea.vmem %s15_s7, 256  ;;  %p79_p1 = scmp.lt.s32.totalorder %s15_s7, %s15_s7 }
   0x4   :  { %p75_p0 = scmp.ne.s32.totalorder %s15_s7, %s74_s8  ;;  %p80_p2 = scmp.lt.s32.totalorder %s74_s8, %s74_s8 }
   0x6   :  { %p81_p3 = por %p80_p2, %p79_p1 }
   0x8   :  { %p82_p4 = pnand %p81_p3, %p75_p0 }
   0xa   :  { %85 = shalt.err (!%p82_p4)
}
   0xb   :  { %17 = dma.hbm_to_vmem [thread:$0]  %s128_s0, 256, %s15_s7, [#allocation3]  }
   0xc   :  { %106 = dma.done.wait [#allocation3], 256  }
   0xd   :  { %107 = vsyncadd [#allocation3], 4294967040  ;;  %v21_v0 = vld [vmem:[#allocation2] sm:$0xff]  ;;  %v22_v1 = vld [vmem:[#allocation2 + $0x8] sm:$0xff]  ;;  %s111_s11 = smov [#allocation5]  }
   0xe   :  { %v23_v2 = vand.u32 2147483647, %v21_v0  ;;  %v24_v3 = vand.u32 2147483647, %v22_v1  ;;  %s51_s0 = sshll.u32 %s111_s11, 4  ;;  %s52_s0 = int_to_ptr.vmem [resolvable:$true] %s51_s0 }
   0xf   :  { %s86_s12 = scalar_lea.vmem %s52_s0, 256  ;;  %p91_p6 = scmp.lt.s32.totalorder %s52_s0, %s52_s0 }
  0x10   :  { %v25_v4 = vadd.f32 1.0, %v23_v2  ;;  %v34_v5 = vadd.f32 1.0, %v24_v3  ;;  %v28_v6 = vmul.f32 -0.5, %v23_v2  ;;  %v37_v7 = vmul.f32 -0.5, %v24_v3  ;;  %p87_p5 = scmp.ne.s32.totalorder %s52_s0, %s86_s12  ;;  %p92_p7 = scmp.lt.s32.totalorder %s86_s12, %s86_s12 }
  0x11   :  { %vm32_vm0 = vcmp.lt.f32.partialorder %v23_v2, 0.0004427343  ;;  %vm41_vm1 = vcmp.lt.f32.partialorder %v24_v3, 0.0004427343 }
  0x12   :  { %62 = vlog2.f32 %v25_v4  ;;  %v29_v8 = vadd.f32 1.0, %v28_v6  ;;  %v38_v9 = vadd.f32 1.0, %v37_v7  ;;  %p93_p8 = por %p92_p7, %p91_p6 }
  0x13   :  { %64 = vlog2.f32 %v34_v5 }
  0x14   :  { %v30_v10 = vmul.f32 %v29_v8, %v23_v2  ;;  %v39_v12 = vmul.f32 %v38_v9, %v24_v3  ;;  %p94_p9 = pnand %p93_p8, %p87_p5 }
  0x1f   :  { %v63_v11 = vpop.eup %62 }
  0x20   :  { %v65_v13 = vpop.eup %64  ;;  %v27_v14 = vmul.f32 0.6931472, %v63_v11 }
  0x21   :  { %v36_v15 = vmul.f32 0.6931472, %v65_v13 }
  0x22   :  { %v33_v16 = vsel %vm32_vm0, %v30_v10, %v27_v14 }
  0x23   :  { %43 = vst [vmem:[#allocation5] sm:$0xff] %v33_v16  ;;  %v42_v17 = vsel %vm41_vm1, %v39_v12, %v36_v15 }
  0x24   :  { %44 = vst [vmem:[#allocation5 + $0x8] sm:$0xff] %v42_v17 }
  0x25   :  { %97 = shalt.err (!%p94_p9)
}
  0x26   :  { %54 = dma.vmem_to_hbm [thread:$0]  %s52_s0, 256, %s129_s1, [#allocation4]  }
  0x27   :  { %108 = dma.done.wait [#allocation4], 256  }
  0x28   :  { %109 = vsyncadd [#allocation4], 4294967040 }
  0x29   :  { %58 = vsyncpa [#allocation3], 1 }
  0x2a   :  { %59 = vsyncpa [#allocation4], 1 }

</bundles_post_ra>
